<compile_context>
chip_gen: v7x
topology: tpu7x:2x2x1
jax: 0.10.0
libtpu: 0.0.40
codegen_flags: <defaults>
</compile_context>

<pallas_src>
import math
from functools import partial

import jax
import jax.numpy as jnp
from jax import lax
from jax.experimental import pallas as pl
from jax.experimental.pallas import tpu as pltpu

RMS_EPS = 1.1920929e-07          # torch.finfo(float32).eps — nn.RMSNorm default when eps=None
NEG_INF = -1e30                  # finite mask value (avoids NaN on masked tiles)
_INV_SQRT2 = 1.0 / math.sqrt(2.0)


def _vmem_budget():
    """~75% of physical VMEM: ~48 MiB on v7x (64 MiB/TC), ~96 MiB on v5e/v6e (128 MiB)."""
    try:
        cap = int(pltpu.get_tpu_info().vmem_capacity_bytes)
    except Exception:
        cap = 64 * 1024 * 1024
    return max(32 * 1024 * 1024, min(cap * 3 // 4, 112 * 1024 * 1024))


VMEM_LIMIT = _vmem_budget()
_BIG_VMEM = VMEM_LIMIT >= 80 * 1024 * 1024      # v5e / v6e class
ATTN_TILE = 256                                  # q/kv tile target (128-aligned)
SEQ_TILE = 512 if _BIG_VMEM else 256             # FF / logits seq tile target
FF_HID_TILE = 1024 if _BIG_VMEM else 512         # FF hidden tile target
VOCAB_TILE = 2048 if _BIG_VMEM else 1024         # logits vocab tile target


def _rmsnorm(x, w):
    ms = jnp.mean(x * x, axis=-1, keepdims=True)
    return x * lax.rsqrt(ms + RMS_EPS) * w


def _pick_tile(n, target, align):
    """Largest tile <= target that divides n and is a multiple of `align`, else full n."""
    if n <= target:
        return n
    t = (target // align) * align
    while t >= align:
        if n % t == 0:
            return t
        t -= align
    return n


def _full_spec(a):
    return pl.BlockSpec(a.shape, lambda *_: (0,) * a.ndim)


# ----------------------------------------------------------------------------
# Kernel 1: pre-norm + fused full-width QKV projections + rotary embedding
# ----------------------------------------------------------------------------
def _qkv_rope_kernel(x_ref, nw_ref, wq_ref, wk_ref, wv_ref,
                     cos_ref, slo_ref, shi_ref,
                     q_ref, k_ref, v_ref, *, kv_heads, group, dim_head):
    dh = dim_head
    half = dh // 2
    gdh = group * dh

    x = x_ref[0]                                              # (TN, D) f32
    xn = _rmsnorm(x, nw_ref[...]).astype(jnp.bfloat16)        # bf16 MXU operand

    cos_t = cos_ref[...]                                      # (TN, H*dh) split-half tables
    sin_lo = slo_ref[...]                                     # [-sin | 0 ] per head, tiled
    sin_hi = shi_ref[...]                                     # [ 0  | sin] per head, tiled

    def rope(y):
        # y: (TN, W) f32 with W a multiple of dh (columns per head are [evens | odds]).
        # Split-half rotation done slab-wide with two circular lane shifts; the wrap-around
        # entries (which would mix neighbouring heads) are zeroed by the masked sin tables,
        # so a single slab pass replaces the former per-head swap/concat + masked stores.
        w = y.shape[-1]
        left = jnp.concatenate([y[:, half:], y[:, :half]], axis=-1)            # y[:, i+half]
        right = jnp.concatenate([y[:, w - half:], y[:, :w - half]], axis=-1)   # y[:, i-half]
        return y * cos_t[:, :w] + left * sin_lo[:, :w] + right * sin_hi[:, :w]

    # Three wide matmuls (full MXU contraction over D).  NOTE: for very large models on v7x
    # (D, H*dh ~ 4096) the resident wq/wk/wv blocks should additionally be tiled over their
    # output columns; at moderate sizes full residency maximizes MXU occupancy.
    yq = rope(jnp.dot(xn, wq_ref[...], preferred_element_type=jnp.float32)).astype(jnp.bfloat16)
    yk = rope(jnp.dot(xn, wk_ref[...], preferred_element_type=jnp.float32)).astype(jnp.bfloat16)
    yv = jnp.dot(xn, wv_ref[...], preferred_element_type=jnp.float32).astype(jnp.bfloat16)

    for j in range(kv_heads):
        q_ref[0, j] = yq[:, j * gdh:(j + 1) * gdh]            # lane-dense (G*dh wide) store
        k_ref[0, j] = yk[:, j * dh:(j + 1) * dh]
        v_ref[0, j] = yv[:, j * dh:(j + 1) * dh]


def qkv_rope(x, nw, wq, wk, wv, cos_t, sin_lo, sin_hi, *, heads, kv_heads, dim_head, tn):
    B, N, D = x.shape
    dh = dim_head
    G = heads // kv_heads
    grid = (B, N // tn)
    kernel = partial(_qkv_rope_kernel, kv_heads=kv_heads, group=G, dim_head=dh)
    tbl_spec = pl.BlockSpec((tn, heads * dh), lambda b, s: (s, 0))
    return pl.pallas_call(
        kernel,
        out_shape=(jax.ShapeDtypeStruct((B, kv_heads, N, G * dh), jnp.bfloat16),
                   jax.ShapeDtypeStruct((B, kv_heads, N, dh), jnp.bfloat16),
                   jax.ShapeDtypeStruct((B, kv_heads, N, dh), jnp.bfloat16)),
        grid=grid,
        in_specs=[pl.BlockSpec((1, tn, D), lambda b, s: (b, s, 0)),
                  _full_spec(nw), _full_spec(wq), _full_spec(wk), _full_spec(wv),
                  tbl_spec, tbl_spec, tbl_spec],
        out_specs=(pl.BlockSpec((1, kv_heads, tn, G * dh), lambda b, s: (b, 0, s, 0)),
                   pl.BlockSpec((1, kv_heads, tn, dh), lambda b, s: (b, 0, s, 0)),
                   pl.BlockSpec((1, kv_heads, tn, dh), lambda b, s: (b, 0, s, 0))),
        compiler_params=pltpu.CompilerParams(
            dimension_semantics=("parallel", "parallel"),
            vmem_limit_bytes=VMEM_LIMIT),
    )(x, nw, wq, wk, wv, cos_t, sin_lo, sin_hi)


# ----------------------------------------------------------------------------
# Kernel 2: flash attention (online softmax) + fused output projection + residual
# grid = (B, q_tiles, kv_tiles); kv is the reduction ("arbitrary") axis.
# All H query heads are processed inside the kernel against one DMA'd K/V tile (GQA reuse).
# ----------------------------------------------------------------------------
def _attn_core_kernel(q_ref, k_ref, v_ref, wo_ref, x_ref, o_ref,
                      m_s, l_s, acc_s, *, tq, tk, dim_head, group, kv_heads):
    qi = pl.program_id(1)
    ki = pl.program_id(2)
    n_kv = pl.num_programs(2)
    dh = dim_head
    heads = kv_heads * group

    @pl.when(ki == 0)
    def _():
        m_s[...] = jnp.full(m_s.shape, -jnp.inf, dtype=m_s.dtype)
        l_s[...] = jnp.zeros(l_s.shape, dtype=l_s.dtype)
        acc_s[...] = jnp.zeros(acc_s.shape, dtype=acc_s.dtype)

    q_start = qi * tq
    k_start = ki * tk

    # Tiles strictly above the causal diagonal: the K/V index_maps clamp to the last in-range
    # tile (no extra HBM traffic) and this guard skips the compute.
    @pl.when(k_start <= q_start + tq - 1)
    def _():
        row = q_start + lax.broadcasted_iota(jnp.int32, (tq, tk), 0)
        col = k_start + lax.broadcasted_iota(jnp.int32, (tq, tk), 1)
        causal = col <= row
        for hkv in range(kv_heads):
            kb = k_ref[0, hkv]                               # (TK, dh) bf16
            vb = v_ref[0, hkv]                               # (TK, dh) bf16
            qg = q_ref[0, hkv]                               # (TQ, G*dh) bf16 (scale in wq)
            for g in range(group):
                h = hkv * group + g
                s = lax.dot_general(qg[:, g * dh:(g + 1) * dh], kb,
                                    (((1,), (1,)), ((), ())),
                                    preferred_element_type=jnp.float32)   # (TQ, TK)
                s = jnp.where(causal, s, NEG_INF)
                m_prev = m_s[h]
                m_new = jnp.maximum(m_prev, jnp.max(s, axis=-1, keepdims=True))
                alpha = jnp.exp(m_prev - m_new)
                p = jnp.exp(s - m_new)
                l_s[h] = alpha * l_s[h] + jnp.sum(p, axis=-1, keepdims=True)
                acc_s[h] = alpha * acc_s[h] + jnp.dot(
                    p.astype(jnp.bfloat16), vb, preferred_element_type=jnp.float32)
                m_s[h] = m_new

    @pl.when(ki == n_kv - 1)
    def _():
        # Fused output projection: one full-contraction (TQ, H*dh) @ (H*dh, D) matmul + residual.
        o_heads = jnp.concatenate(
            [(acc_s[h] * pl.reciprocal(l_s[h], approx=True)).astype(jnp.bfloat16)
             for h in range(heads)], axis=-1)                # (TQ, H*dh)
        proj = jnp.dot(o_heads, wo_ref[...], preferred_element_type=jnp.float32)
        o_ref[0] = (x_ref[0] + proj).astype(o_ref.dtype)


def attention_core(q, k, v, wo, x, *, heads, kv_heads, dim_head, tq, tk):
    B, N, D = x.shape
    dh = dim_head
    G = heads // kv_heads
    grid = (B, N // tq, N // tk)

    def kv_index(b, qi, ki):
        # Clamp above-diagonal kv steps to the last in-range tile: identical block index means
        # Pallas skips the re-DMA, so masked K/V tiles cost no HBM bandwidth.
        kmax = ((qi + 1) * tq - 1) // tk
        return (b, 0, jnp.minimum(ki, kmax), 0)

    kernel = partial(_attn_core_kernel, tq=tq, tk=tk, dim_head=dh,
                     group=G, kv_heads=kv_heads)
    return pl.pallas_call(
        kernel,
        out_shape=jax.ShapeDtypeStruct((B, N, D), x.dtype),
        grid=grid,
        in_specs=[
            pl.BlockSpec((1, kv_heads, tq, G * dh), lambda b, qi, ki: (b, 0, qi, 0)),
            pl.BlockSpec((1, kv_heads, tk, dh), kv_index),
            pl.BlockSpec((1, kv_heads, tk, dh), kv_index),
            _full_spec(wo),
            pl.BlockSpec((1, tq, D), lambda b, qi, ki: (b, qi, 0)),     # residual
        ],
        out_specs=pl.BlockSpec((1, tq, D), lambda b, qi, ki: (b, qi, 0)),
        scratch_shapes=[pltpu.VMEM((heads, tq, 1), jnp.float32),        # running max
                        pltpu.VMEM((heads, tq, 1), jnp.float32),        # running denom
                        pltpu.VMEM((heads, tq, dh), jnp.float32)],      # per-head acc
        compiler_params=pltpu.CompilerParams(
            dimension_semantics=("parallel", "parallel", "arbitrary"),
            vmem_limit_bytes=VMEM_LIMIT),
    )(q, k, v, wo, x)


def attention_layer(x, nw, wq, wk, wv, wo, cos_t, sin_lo, sin_hi, *,
                    heads, kv_heads, dim_head):
    B, N, D = x.shape
    t = _pick_tile(N, ATTN_TILE, 128)          # 128-aligned score tiles (or full N)
    q, k, v = qkv_rope(x, nw, wq, wk, wv, cos_t, sin_lo, sin_hi,
                       heads=heads, kv_heads=kv_heads, dim_head=dim_head, tn=t)
    return attention_core(q, k, v, wo, x, heads=heads, kv_heads=kv_heads,
                          dim_head=dim_head, tq=t, tk=t)


# ----------------------------------------------------------------------------
# Kernel 3: pre-norm MLP (exact erf GELU), tiled over the hidden dim, + residual
# ----------------------------------------------------------------------------
def _ff_kernel(x_ref, nw_ref, w1_ref, b1_ref, w2_ref, b2_ref, o_ref, xn_s, acc_s):
    th = pl.program_id(2)
    n_th = pl.num_programs(2)

    @pl.when(th == 0)
    def _():
        xn_s[...] = _rmsnorm(x_ref[0], nw_ref[...]).astype(jnp.bfloat16)
        acc_s[...] = jnp.zeros(acc_s.shape, dtype=acc_s.dtype)

    h = jnp.dot(xn_s[...], w1_ref[...], preferred_element_type=jnp.float32) + b1_ref[...]
    g = 0.5 * h * (1.0 + lax.erf(h * _INV_SQRT2))          # nn.GELU() exact (erf) form
    acc_s[...] += jnp.dot(g.astype(jnp.bfloat16), w2_ref[...],
                          preferred_element_type=jnp.float32)

    @pl.when(th == n_th - 1)
    def _():
        o_ref[0] = (acc_s[...] + b2_ref[...] + x_ref[0]).astype(o_ref.dtype)


def feedforward_block(x, nw, w1, b1, w2, b2):
    B, N, D = x.shape
    hid = w1.shape[1]
    tn = _pick_tile(N, SEQ_TILE, 8)
    th = _pick_tile(hid, FF_HID_TILE, 128)
    grid = (B, N // tn, hid // th)
    return pl.pallas_call(
        _ff_kernel,
        out_shape=jax.ShapeDtypeStruct((B, N, D), x.dtype),
        grid=grid,
        in_specs=[pl.BlockSpec((1, tn, D), lambda b, s, t: (b, s, 0)),
                  pl.BlockSpec((1, D), lambda b, s, t: (0, 0)),
                  pl.BlockSpec((D, th), lambda b, s, t: (0, t)),
                  pl.BlockSpec((1, th), lambda b, s, t: (0, t)),
                  pl.BlockSpec((th, D), lambda b, s, t: (t, 0)),
                  pl.BlockSpec((1, D), lambda b, s, t: (0, 0))],
        out_specs=pl.BlockSpec((1, tn, D), lambda b, s, t: (b, s, 0)),
        scratch_shapes=[pltpu.VMEM((tn, D), jnp.bfloat16),
                        pltpu.VMEM((tn, D), jnp.float32)],
        compiler_params=pltpu.CompilerParams(
            dimension_semantics=("parallel", "parallel", "arbitrary"),
            vmem_limit_bytes=VMEM_LIMIT),
    )(x, nw, w1, b1, w2, b2)


# ----------------------------------------------------------------------------
# Kernel 4: final RMSNorm + vocabulary projection, tiled over the vocab
# ----------------------------------------------------------------------------
def _logits_kernel(x_ref, nw_ref, wl_ref, o_ref, xn_s):
    @pl.when(pl.program_id(2) == 0)
    def _():
        xn_s[...] = _rmsnorm(x_ref[0], nw_ref[...]).astype(jnp.bfloat16)

    o_ref[0] = jnp.dot(xn_s[...], wl_ref[...],
                       preferred_element_type=jnp.float32).astype(o_ref.dtype)


def logits_block(x, nw, wl):
    B, N, D = x.shape
    V = wl.shape[1]
    tn = _pick_tile(N, SEQ_TILE, 8)
    tv = _pick_tile(V, VOCAB_TILE, 128)
    grid = (B, N // tn, V // tv)
    return pl.pallas_call(
        _logits_kernel,
        out_shape=jax.ShapeDtypeStruct((B, N, V), jnp.float32),
        grid=grid,
        in_specs=[pl.BlockSpec((1, tn, D), lambda b, s, t: (b, s, 0)),
                  pl.BlockSpec((1, D), lambda b, s, t: (0, 0)),
                  pl.BlockSpec((D, tv), lambda b, s, t: (0, t))],
        out_specs=pl.BlockSpec((1, tn, tv), lambda b, s, t: (b, s, t)),
        scratch_shapes=[pltpu.VMEM((tn, D), jnp.bfloat16)],
        compiler_params=pltpu.CompilerParams(
            dimension_semantics=("parallel", "parallel", "arbitrary"),
            vmem_limit_bytes=VMEM_LIMIT),
    )(x, nw, wl)


# ----------------------------------------------------------------------------
# Parameter construction (kernel-layout weights) + full forward pass
# ----------------------------------------------------------------------------
def _split_rope_cols(w, dim_head):
    """Per-head column reorder: interleaved (even, odd) rotary pairs -> [evens | odds].
    Applied identically to q and k, so scores (and the module output) are unchanged."""
    din, dout = w.shape
    nh = dout // dim_head
    w = w.reshape(din, nh, dim_head // 2, 2)
    return jnp.concatenate([w[..., 0], w[..., 1]], axis=-1).reshape(din, dout)


def _group_q_heads(w, dim_head, heads, kv_heads):
    """Reorder q-head blocks from PyTorch '(g h)' order (head = g*kv_heads + hkv) to
    grouped-by-kv-head order (hkv major, g minor) used by the GQA attention kernel."""
    din = w.shape[0]
    g = heads // kv_heads
    w = w.reshape(din, g, kv_heads, dim_head)
    w = jnp.transpose(w, (0, 2, 1, 3))
    return w.reshape(din, heads * dim_head)


def _group_o_rows(w, dim_head, heads, kv_heads):
    """Reorder wo rows with exactly the same head permutation as _group_q_heads."""
    dout = w.shape[1]
    g = heads // kv_heads
    w = w.reshape(g, kv_heads, dim_head, dout)
    w = jnp.transpose(w, (1, 0, 2, 3))
    return w.reshape(heads * dim_head, dout)


def init_params(key, *, num_tokens, dim, depth, dim_head, heads, kv_heads, ff_expansion):
    assert heads % kv_heads == 0
    hidden = int(dim * ff_expansion)
    dim_inner = heads * dim_head
    dim_kv_inner = kv_heads * dim_head
    scale = 1.0 / math.sqrt(dim_head)          # softmax scale, folded into wq (commutes w/ rope)

    def lin(k, din, dout):
        return jax.random.normal(k, (din, dout), jnp.float32) * (1.0 / math.sqrt(din))

    keys = iter(jax.random.split(key, 3 + depth * 6))
    params = dict(
        heads=heads, kv_heads=kv_heads, dim_head=dim_head,
        emb=jax.random.normal(next(keys), (num_tokens, dim), jnp.float32) * 0.02,
        final_norm=jnp.ones((1, dim), jnp.float32),
        w_logits=lin(next(keys), dim, num_tokens).astype(jnp.bfloat16),
        layers=[],
    )
    for _ in range(depth):
        wq = lin(next(keys), dim, dim_inner)
        wk = lin(next(keys), dim, dim_kv_inner)
        wv = lin(next(keys), dim, dim_kv_inner)
        wo = lin(next(keys), dim_inner, dim)
        wq_k = _group_q_heads(_split_rope_cols(wq, dim_head), dim_head, heads, kv_heads) * scale
        wk_k = _split_rope_cols(wk, dim_head)
        wo_k = _group_o_rows(wo, dim_head, heads, kv_heads)
        layer = dict(
            attn_norm=jnp.ones((1, dim), jnp.float32),
            wq=wq_k.astype(jnp.bfloat16),            # (D, H*dh), grouped heads, scale folded in
            wk=wk_k.astype(jnp.bfloat16),            # (D, KVH*dh)
            wv=wv.astype(jnp.bfloat16),              # (D, KVH*dh)
            wo=wo_k.astype(jnp.bfloat16),            # (H*dh, D), rows in grouped-head order
            ff_norm=jnp.ones((1, dim), jnp.float32),
            w1=lin(next(keys), dim, hidden).astype(jnp.bfloat16),
            b1=jnp.zeros((1, hidden), jnp.float32),
            w2=lin(next(keys), hidden, dim).astype(jnp.bfloat16),
            b2=jnp.zeros((1, dim), jnp.float32),
        )
        params['layers'].append(layer)
    return params


def transformer_forward(params, ids):
    # token embedding gather (glue, no hot-path compute)
    x = jnp.take(params['emb'], ids, axis=0)                 # (B, N, D) f32
    N = ids.shape[-1]
    dh = params['dim_head']
    heads = params['heads']
    kvh = params['kv_heads']

    # rotary tables (RotaryEmbedding(dim_head), theta=10000) in split-half layout, tiled to the
    # full q width (H*dh); the k tables are the KVH*dh-wide prefix (pattern is dh-periodic).
    # sin_lo / sin_hi are half-masked so the slab-wide lane shifts in the kernel never mix heads.
    inv_freq = 1.0 / (10000.0 ** (jnp.arange(0, dh, 2, dtype=jnp.float32) / dh))
    t = jnp.arange(N, dtype=jnp.float32)
    freqs = t[:, None] * inv_freq[None, :]                   # (N, dh//2)
    cos, sin = jnp.cos(freqs), jnp.sin(freqs)
    zeros = jnp.zeros_like(sin)
    cos_t = jnp.tile(jnp.concatenate([cos, cos], axis=-1), (1, heads))      # (N, H*dh)
    sin_lo = jnp.tile(jnp.concatenate([-sin, zeros], axis=-1), (1, heads))  # (N, H*dh)
    sin_hi = jnp.tile(jnp.concatenate([zeros, sin], axis=-1), (1, heads))   # (N, H*dh)

    for layer in params['layers']:
        x = attention_layer(x, layer['attn_norm'], layer['wq'], layer['wk'],
                            layer['wv'], layer['wo'], cos_t, sin_lo, sin_hi,
                            heads=heads, kv_heads=kvh, dim_head=dh)
        x = feedforward_block(x, layer['ff_norm'], layer['w1'], layer['b1'],
                              layer['w2'], layer['b2'])
    return logits_block(x, params['final_norm'], params['w_logits'])


# TODO(synk): sample()/KV-cache/cross-entropy-loss paths of the module are inference/training
# conveniences outside the requested forward hot path and are not reproduced here.

if __name__ == "__main__":
    NUM_TOKENS, DIM, DEPTH = 128, 64, 2
    DIM_HEAD, HEADS, KV_HEADS = 64, 4, 2
    BATCH, SEQ = 2, 16

    key = jax.random.PRNGKey(0)
    k_params, k_ids = jax.random.split(key)
    params = init_params(k_params, num_tokens=NUM_TOKENS, dim=DIM, depth=DEPTH,
                         dim_head=DIM_HEAD, heads=HEADS, kv_heads=KV_HEADS,
                         ff_expansion=4.0)
    ids = jax.random.randint(k_ids, (BATCH, SEQ), 0, NUM_TOKENS)

    logits = transformer_forward(params, ids)
    logits = jax.block_until_ready(logits)

    assert logits.shape == (BATCH, SEQ, NUM_TOKENS)
    assert bool(jnp.all(jnp.isfinite(logits)))
    print("KERNEL_OK")
</pallas_src>

<mosaic_0001>
module attributes {stable_mosaic.version = 11 : i64} {
  func.func @_qkv_rope_kernel(%arg0: i32, %arg1: i32, %arg2: memref<1x16x64xf32, #tpu.memory_space<vmem>>, %arg3: memref<1x64xf32, #tpu.memory_space<vmem>>, %arg4: memref<64x256xbf16, #tpu.memory_space<vmem>>, %arg5: memref<64x128xbf16, #tpu.memory_space<vmem>>, %arg6: memref<64x128xbf16, #tpu.memory_space<vmem>>, %arg7: memref<16x256xf32, #tpu.memory_space<vmem>>, %arg8: memref<16x256xf32, #tpu.memory_space<vmem>>, %arg9: memref<16x256xf32, #tpu.memory_space<vmem>>, %arg10: memref<1x2x16x128xbf16, #tpu.memory_space<vmem>>, %arg11: memref<1x2x16x64xbf16, #tpu.memory_space<vmem>>, %arg12: memref<1x2x16x64xbf16, #tpu.memory_space<vmem>>) attributes {dimension_semantics = [#tpu.dimension_semantics<parallel>, #tpu.dimension_semantics<parallel>], iteration_bounds = array<i64: 2, 1>, scalar_prefetch = 0 : i64, scratch_operands = 0 : i64, tpu.core_type = #tpu.core_type<tc>, window_params = [{transform_indices = @transform_0, window_bounds = array<i64: 1, 16, 64>}, {pipeline_mode = #tpu.pipeline_mode<synchronous>, transform_indices = @transform_1, window_bounds = array<i64: 1, 64>}, {pipeline_mode = #tpu.pipeline_mode<synchronous>, transform_indices = @transform_2, window_bounds = array<i64: 64, 256>}, {pipeline_mode = #tpu.pipeline_mode<synchronous>, transform_indices = @transform_3, window_bounds = array<i64: 64, 128>}, {pipeline_mode = #tpu.pipeline_mode<synchronous>, transform_indices = @transform_4, window_bounds = array<i64: 64, 128>}, {transform_indices = @transform_5, window_bounds = array<i64: 16, 256>}, {transform_indices = @transform_6, window_bounds = array<i64: 16, 256>}, {transform_indices = @transform_7, window_bounds = array<i64: 16, 256>}, {transform_indices = @transform_8, window_bounds = array<i64: 1, 2, 16, 128>}, {transform_indices = @transform_9, window_bounds = array<i64: 1, 2, 16, 64>}, {transform_indices = @transform_10, window_bounds = array<i64: 1, 2, 16, 64>}]} {
    %c0 = arith.constant 0 : index
    %c0_0 = arith.constant 0 : index
    %c0_1 = arith.constant 0 : index
    %0 = vector.load %arg2[%c0, %c0_0, %c0_1] : memref<1x16x64xf32, #tpu.memory_space<vmem>>, vector<1x16x64xf32>
    %1 = vector.shape_cast %0 : vector<1x16x64xf32> to vector<16x64xf32>
    %c0_2 = arith.constant 0 : index
    %c0_3 = arith.constant 0 : index
    %2 = vector.load %arg3[%c0_2, %c0_3] : memref<1x64xf32, #tpu.memory_space<vmem>>, vector<1x64xf32>
    %3 = arith.mulf %1, %1 : vector<16x64xf32>
    %cst = arith.constant dense<0.000000e+00> : vector<16xf32>
    %4 = vector.multi_reduction <add>, %3, %cst [1] : vector<16x64xf32> to vector<16xf32>
    %5 = vector.shape_cast %4 : vector<16xf32> to vector<16x1xf32>
    %cst_4 = arith.constant 6.400000e+01 : f32
    %6 = vector.broadcast %cst_4 : f32 to vector<16x1xf32>
    %7 = arith.divf %5, %6 : vector<16x1xf32>
    %cst_5 = arith.constant 1.1920929E-7 : f32
    %8 = vector.broadcast %cst_5 : f32 to vector<16x1xf32>
    %9 = arith.addf %7, %8 : vector<16x1xf32>
    %10 = math.rsqrt %9 : vector<16x1xf32>
    %11 = vector.broadcast %10 : vector<16x1xf32> to vector<16x64xf32>
    %12 = arith.mulf %1, %11 : vector<16x64xf32>
    %13 = vector.broadcast %2 : vector<1x64xf32> to vector<16x64xf32>
    %14 = arith.mulf %12, %13 : vector<16x64xf32>
    %15 = arith.truncf %14 : vector<16x64xf32> to vector<16x64xbf16>
    %c0_6 = arith.constant 0 : index
    %c0_7 = arith.constant 0 : index
    %16 = vector.load %arg7[%c0_6, %c0_7] : memref<16x256xf32, #tpu.memory_space<vmem>>, vector<16x256xf32>
    %c0_8 = arith.constant 0 : index
    %c0_9 = arith.constant 0 : index
    %17 = vector.load %arg8[%c0_8, %c0_9] : memref<16x256xf32, #tpu.memory_space<vmem>>, vector<16x256xf32>
    %c0_10 = arith.constant 0 : index
    %c0_11 = arith.constant 0 : index
    %18 = vector.load %arg9[%c0_10, %c0_11] : memref<16x256xf32, #tpu.memory_space<vmem>>, vector<16x256xf32>
    %c0_12 = arith.constant 0 : index
    %c0_13 = arith.constant 0 : index
    %19 = vector.load %arg4[%c0_12, %c0_13] : memref<64x256xbf16, #tpu.memory_space<vmem>>, vector<64x256xbf16>
    %cst_14 = arith.constant dense<0.000000e+00> : vector<16x256xf32>
    %20 = tpu.matmul %15, %19, %cst_14 {dimension_numbers = #tpu.dot_dimension_numbers<[1], [0], [0], [1], [0, 0, 1, 1], [], []>} : vector<16x64xbf16>, vector<64x256xbf16>, vector<16x256xf32> -> vector<16x256xf32>
    %21 = vector.extract_strided_slice %20 {offsets = [0, 32], sizes = [16, 224], strides = [1, 1]} : vector<16x256xf32> to vector<16x224xf32>
    %22 = vector.extract_strided_slice %20 {offsets = [0, 0], sizes = [16, 32], strides = [1, 1]} : vector<16x256xf32> to vector<16x32xf32>
    %23 = tpu.concatenate %21, %22 in 1 : vector<16x224xf32>, vector<16x32xf32> -> vector<16x256xf32>
    %24 = vector.extract_strided_slice %20 {offsets = [0, 224], sizes = [16, 32], strides = [1, 1]} : vector<16x256xf32> to vector<16x32xf32>
    %25 = vector.extract_strided_slice %20 {offsets = [0, 0], sizes = [16, 224], strides = [1, 1]} : vector<16x256xf32> to vector<16x224xf32>
    %26 = tpu.concatenate %24, %25 in 1 : vector<16x32xf32>, vector<16x224xf32> -> vector<16x256xf32>
    %27 = arith.mulf %20, %16 : vector<16x256xf32>
    %28 = arith.mulf %23, %17 : vector<16x256xf32>
    %29 = arith.addf %27, %28 : vector<16x256xf32>
    %30 = arith.mulf %26, %18 : vector<16x256xf32>
    %31 = arith.addf %29, %30 : vector<16x256xf32>
    %32 = arith.truncf %31 : vector<16x256xf32> to vector<16x256xbf16>
    %c0_15 = arith.constant 0 : index
    %c0_16 = arith.constant 0 : index
    %33 = vector.load %arg5[%c0_15, %c0_16] : memref<64x128xbf16, #tpu.memory_space<vmem>>, vector<64x128xbf16>
    %cst_17 = arith.constant dense<0.000000e+00> : vector<16x128xf32>
    %34 = tpu.matmul %15, %33, %cst_17 {dimension_numbers = #tpu.dot_dimension_numbers<[1], [0], [0], [1], [0, 0, 1, 1], [], []>} : vector<16x64xbf16>, vector<64x128xbf16>, vector<16x128xf32> -> vector<16x128xf32>
    %35 = vector.extract_strided_slice %34 {offsets = [0, 32], sizes = [16, 96], strides = [1, 1]} : vector<16x128xf32> to vector<16x96xf32>
    %36 = vector.extract_strided_slice %34 {offsets = [0, 0], sizes = [16, 32], strides = [1, 1]} : vector<16x128xf32> to vector<16x32xf32>
    %37 = tpu.concatenate %35, %36 in 1 : vector<16x96xf32>, vector<16x32xf32> -> vector<16x128xf32>
    %38 = vector.extract_strided_slice %34 {offsets = [0, 96], sizes = [16, 32], strides = [1, 1]} : vector<16x128xf32> to vector<16x32xf32>
    %39 = vector.extract_strided_slice %34 {offsets = [0, 0], sizes = [16, 96], strides = [1, 1]} : vector<16x128xf32> to vector<16x96xf32>
    %40 = tpu.concatenate %38, %39 in 1 : vector<16x32xf32>, vector<16x96xf32> -> vector<16x128xf32>
    %41 = vector.extract_strided_slice %16 {offsets = [0, 0], sizes = [16, 128], strides = [1, 1]} : vector<16x256xf32> to vector<16x128xf32>
    %42 = arith.mulf %34, %41 : vector<16x128xf32>
    %43 = vector.extract_strided_slice %17 {offsets = [0, 0], sizes = [16, 128], strides = [1, 1]} : vector<16x256xf32> to vector<16x128xf32>
    %44 = arith.mulf %37, %43 : vector<16x128xf32>
    %45 = arith.addf %42, %44 : vector<16x128xf32>
    %46 = vector.extract_strided_slice %18 {offsets = [0, 0], sizes = [16, 128], strides = [1, 1]} : vector<16x256xf32> to vector<16x128xf32>
    %47 = arith.mulf %40, %46 : vector<16x128xf32>
    %48 = arith.addf %45, %47 : vector<16x128xf32>
    %49 = arith.truncf %48 : vector<16x128xf32> to vector<16x128xbf16>
    %c0_18 = arith.constant 0 : index
    %c0_19 = arith.constant 0 : index
    %50 = vector.load %arg6[%c0_18, %c0_19] : memref<64x128xbf16, #tpu.memory_space<vmem>>, vector<64x128xbf16>
    %cst_20 = arith.constant dense<0.000000e+00> : vector<16x128xf32>
    %51 = tpu.matmul %15, %50, %cst_20 {dimension_numbers = #tpu.dot_dimension_numbers<[1], [0], [0], [1], [0, 0, 1, 1], [], []>} : vector<16x64xbf16>, vector<64x128xbf16>, vector<16x128xf32> -> vector<16x128xf32>
    %52 = arith.truncf %51 : vector<16x128xf32> to vector<16x128xbf16>
    %53 = vector.extract_strided_slice %32 {offsets = [0, 0], sizes = [16, 128], strides = [1, 1]} : vector<16x256xbf16> to vector<16x128xbf16>
    %c0_21 = arith.constant 0 : index
    %c0_22 = arith.constant 0 : index
    %c0_23 = arith.constant 0 : index
    %c0_24 = arith.constant 0 : index
    %54 = vector.load %arg10[%c0_21, %c0_22, %c0_23, %c0_24] : memref<1x2x16x128xbf16, #tpu.memory_space<vmem>>, vector<1x1x16x128xbf16>
    %55 = vector.shape_cast %54 : vector<1x1x16x128xbf16> to vector<16x128xbf16>
    %56 = vector.shape_cast %53 : vector<16x128xbf16> to vector<1x1x16x128xbf16>
    tpu.vector_store %arg10[%c0_21, %c0_22, %c0_23, %c0_24], %56 {strides = array<i32>} : memref<1x2x16x128xbf16, #tpu.memory_space<vmem>>, vector<1x1x16x128xbf16>,
    %57 = vector.extract_strided_slice %49 {offsets = [0, 0], sizes = [16, 64], strides = [1, 1]} : vector<16x128xbf16> to vector<16x64xbf16>
    %c0_25 = arith.constant 0 : index
    %c0_26 = arith.constant 0 : index
    %c0_27 = arith.constant 0 : index
    %c0_28 = arith.constant 0 : index
    %58 = vector.load %arg11[%c0_25, %c0_26, %c0_27, %c0_28] : memref<1x2x16x64xbf16, #tpu.memory_space<vmem>>, vector<1x1x16x64xbf16>
    %59 = vector.shape_cast %58 : vector<1x1x16x64xbf16> to vector<16x64xbf16>
    %60 = vector.shape_cast %57 : vector<16x64xbf16> to vector<1x1x16x64xbf16>
    tpu.vector_store %arg11[%c0_25, %c0_26, %c0_27, %c0_28], %60 {strides = array<i32>} : memref<1x2x16x64xbf16, #tpu.memory_space<vmem>>, vector<1x1x16x64xbf16>,
    %61 = vector.extract_strided_slice %52 {offsets = [0, 0], sizes = [16, 64], strides = [1, 1]} : vector<16x128xbf16> to vector<16x64xbf16>
    %c0_29 = arith.constant 0 : index
    %c0_30 = arith.constant 0 : index
    %c0_31 = arith.constant 0 : index
    %c0_32 = arith.constant 0 : index
    %62 = vector.load %arg12[%c0_29, %c0_30, %c0_31, %c0_32] : memref<1x2x16x64xbf16, #tpu.memory_space<vmem>>, vector<1x1x16x64xbf16>
    %63 = vector.shape_cast %62 : vector<1x1x16x64xbf16> to vector<16x64xbf16>
    %64 = vector.shape_cast %61 : vector<16x64xbf16> to vector<1x1x16x64xbf16>
    tpu.vector_store %arg12[%c0_29, %c0_30, %c0_31, %c0_32], %64 {strides = array<i32>} : memref<1x2x16x64xbf16, #tpu.memory_space<vmem>>, vector<1x1x16x64xbf16>,
    %65 = vector.extract_strided_slice %32 {offsets = [0, 128], sizes = [16, 128], strides = [1, 1]} : vector<16x256xbf16> to vector<16x128xbf16>
    %c0_33 = arith.constant 0 : index
    %c1 = arith.constant 1 : index
    %c0_34 = arith.constant 0 : index
    %c0_35 = arith.constant 0 : index
    %66 = vector.load %arg10[%c0_33, %c1, %c0_34, %c0_35] : memref<1x2x16x128xbf16, #tpu.memory_space<vmem>>, vector<1x1x16x128xbf16>
    %67 = vector.shape_cast %66 : vector<1x1x16x128xbf16> to vector<16x128xbf16>
    %68 = vector.shape_cast %65 : vector<16x128xbf16> to vector<1x1x16x128xbf16>
    tpu.vector_store %arg10[%c0_33, %c1, %c0_34, %c0_35], %68 {strides = array<i32>} : memref<1x2x16x128xbf16, #tpu.memory_space<vmem>>, vector<1x1x16x128xbf16>,
    %69 = vector.extract_strided_slice %49 {offsets = [0, 64], sizes = [16, 64], strides = [1, 1]} : vector<16x128xbf16> to vector<16x64xbf16>
    %c0_36 = arith.constant 0 : index
    %c1_37 = arith.constant 1 : index
    %c0_38 = arith.constant 0 : index
    %c0_39 = arith.constant 0 : index
    %70 = vector.load %arg11[%c0_36, %c1_37, %c0_38, %c0_39] : memref<1x2x16x64xbf16, #tpu.memory_space<vmem>>, vector<1x1x16x64xbf16>
    %71 = vector.shape_cast %70 : vector<1x1x16x64xbf16> to vector<16x64xbf16>
    %72 = vector.shape_cast %69 : vector<16x64xbf16> to vector<1x1x16x64xbf16>
    tpu.vector_store %arg11[%c0_36, %c1_37, %c0_38, %c0_39], %72 {strides = array<i32>} : memref<1x2x16x64xbf16, #tpu.memory_space<vmem>>, vector<1x1x16x64xbf16>,
    %73 = vector.extract_strided_slice %52 {offsets = [0, 64], sizes = [16, 64], strides = [1, 1]} : vector<16x128xbf16> to vector<16x64xbf16>
    %c0_40 = arith.constant 0 : index
    %c1_41 = arith.constant 1 : index
    %c0_42 = arith.constant 0 : index
    %c0_43 = arith.constant 0 : index
    %74 = vector.load %arg12[%c0_40, %c1_41, %c0_42, %c0_43] : memref<1x2x16x64xbf16, #tpu.memory_space<vmem>>, vector<1x1x16x64xbf16>
    %75 = vector.shape_cast %74 : vector<1x1x16x64xbf16> to vector<16x64xbf16>
    %76 = vector.shape_cast %73 : vector<16x64xbf16> to vector<1x1x16x64xbf16>
    tpu.vector_store %arg12[%c0_40, %c1_41, %c0_42, %c0_43], %76 {strides = array<i32>} : memref<1x2x16x64xbf16, #tpu.memory_space<vmem>>, vector<1x1x16x64xbf16>,
    return
  }
  func.func @transform_0(%arg0: i32, %arg1: i32) -> (i32, i32, i32) {
    %c0_i32 = arith.constant 0 : i32
    %c0_i32_0 = arith.constant 0 : i32
    return %arg0, %arg1, %c0_i32 : i32, i32, i32
  }
  func.func @transform_1(%arg0: i32, %arg1: i32) -> (i32, i32) {
    %c0_i32 = arith.constant 0 : i32
    %c0_i32_0 = arith.constant 0 : i32
    %c0_i32_1 = arith.constant 0 : i32
    return %c0_i32, %c0_i32_0 : i32, i32
  }
  func.func @transform_2(%arg0: i32, %arg1: i32) -> (i32, i32) {
    %c0_i32 = arith.constant 0 : i32
    %c0_i32_0 = arith.constant 0 : i32
    %c0_i32_1 = arith.constant 0 : i32
    return %c0_i32, %c0_i32_0 : i32, i32
  }
  func.func @transform_3(%arg0: i32, %arg1: i32) -> (i32, i32) {
    %c0_i32 = arith.constant 0 : i32
    %c0_i32_0 = arith.constant 0 : i32
    %c0_i32_1 = arith.constant 0 : i32
    return %c0_i32, %c0_i32_0 : i32, i32
  }
  func.func @transform_4(%arg0: i32, %arg1: i32) -> (i32, i32) {
    %c0_i32 = arith.constant 0 : i32
    %c0_i32_0 = arith.constant 0 : i32
    %c0_i32_1 = arith.constant 0 : i32
    return %c0_i32, %c0_i32_0 : i32, i32
  }
  func.func @transform_5(%arg0: i32, %arg1: i32) -> (i32, i32) {
    %c0_i32 = arith.constant 0 : i32
    %c0_i32_0 = arith.constant 0 : i32
    return %arg1, %c0_i32 : i32, i32
  }
  func.func @transform_6(%arg0: i32, %arg1: i32) -> (i32, i32) {
    %c0_i32 = arith.constant 0 : i32
    %c0_i32_0 = arith.constant 0 : i32
    return %arg1, %c0_i32 : i32, i32
  }
  func.func @transform_7(%arg0: i32, %arg1: i32) -> (i32, i32) {
    %c0_i32 = arith.constant 0 : i32
    %c0_i32_0 = arith.constant 0 : i32
    return %arg1, %c0_i32 : i32, i32
  }
  func.func @transform_8(%arg0: i32, %arg1: i32) -> (i32, i32, i32, i32) {
    %c0_i32 = arith.constant 0 : i32
    %c0_i32_0 = arith.constant 0 : i32
    %c0_i32_1 = arith.constant 0 : i32
    return %arg0, %c0_i32, %arg1, %c0_i32_0 : i32, i32, i32, i32
  }
  func.func @transform_9(%arg0: i32, %arg1: i32) -> (i32, i32, i32, i32) {
    %c0_i32 = arith.constant 0 : i32
    %c0_i32_0 = arith.constant 0 : i32
    %c0_i32_1 = arith.constant 0 : i32
    return %arg0, %c0_i32, %arg1, %c0_i32_0 : i32, i32, i32, i32
  }
  func.func @transform_10(%arg0: i32, %arg1: i32) -> (i32, i32, i32, i32) {
    %c0_i32 = arith.constant 0 : i32
    %c0_i32_0 = arith.constant 0 : i32
    %c0_i32_1 = arith.constant 0 : i32
    return %arg0, %c0_i32, %arg1, %c0_i32_0 : i32, i32, i32, i32
  }
}

</mosaic_0001>

<bundles_post_ra>
// kernel: tpu_custom_call.1
= control target key start
LH: loop header
LB: loop body
LE: loop exit
PB: predicated region body
PF: predicated region fallthrough
CT: control target
= control target key end

     0   :  { %s2484_s0 = inlined_call_operand.hbm [shape: f32[2,16,64], index: 0, kind: input, shape index: {}]   ;;  %s2485_s1 = inlined_call_operand.vmem [shape: f32[1,64], index: 1, kind: input, shape index: {}]   ;;  %s2486_s2 = inlined_call_operand.hbm [shape: bf16[64,256], index: 2, kind: input, shape index: {}]   ;;  %s2487_s3 = inlined_call_operand.hbm [shape: bf16[64,128], index: 3, kind: input, shape index: {}]   ;;  %s2488_s4 = inlined_call_operand.hbm [shape: bf16[64,128], index: 4, kind: input, shape index: {}]   ;;  %s2489_s5 = inlined_call_operand.hbm [shape: f32[16,256], index: 5, kind: input, shape index: {}]   ;;  %s2490_s6 = inlined_call_operand.hbm [shape: f32[16,256], index: 6, kind: input, shape index: {}]   ;;  %s2491_s7 = inlined_call_operand.hbm [shape: f32[16,256], index: 7, kind: input, shape index: {}]   ;;  %s2492_s8 = inlined_call_operand.hbm [shape: bf16[2,2,16,128], index: 8, kind: output, shape index: {0}]   ;;  %s2493_s9 = inlined_call_operand.hbm [shape: bf16[2,2,16,64], index: 9, kind: output, shape index: {1}]   ;;  %s2494_s10 = inlined_call_operand.hbm [shape: bf16[2,2,16,64], index: 10, kind: output, shape index: {2}]  }
   0x1   :  { %2513 = sst [smem:[#allocation24_spill]] %s2484_s0 }
   0x2   :  { %2514 = sst [smem:[#allocation25_spill]] %s2485_s1 }
   0x3   :  { %2515 = sst [smem:[#allocation26_spill]] %s2486_s2 }
   0x4   :  { %2516 = sst [smem:[#allocation27_spill]] %s2492_s8 }
   0x5   :  { %2517 = sst [smem:[#allocation28_spill]] %s2493_s9 }
   0x6   :  { %2518 = sst [smem:[#allocation29_spill]] %s2494_s10 }
   0x7   :  { %16 = vsyncpa [#allocation3], 0 }
   0x8   :  { %18 = vsyncpa [#allocation3 + $0x1], 0 }
   0x9   :  { %19 = vsyncpa [#allocation6], 0 }
   0xa   :  { %20 = vsyncpa [#allocation9], 0 }
   0xb   :  { %21 = vsyncpa [#allocation12], 0 }
   0xc   :  { %22 = vsyncpa [#allocation4], 0 }
   0xd   :  { %24 = vsyncpa [#allocation4 + $0x1], 0 }
   0xe   :  { %25 = vsyncpa [#allocation16], 0 }
   0xf   :  { %27 = vsyncpa [#allocation16 + $0x1], 0  ;;  %s1975_s13 = smov 0   ;;  %s1977_s14 = smov 0  }
  0x10   :  { %s1979_s15 = smov 0   ;;  %s1981_s16 = smov 0  }
  0x11   :  { %s1983_s17 = smov 0   ;;  %s1985_s18 = smov 0  }
  0x12 LB: > { %s2006_s19 = sadd.s32 4294967295, %s1895_s18   ;;  %p1249_p0 = scmp.ge.s32.totalorder %s1895_s18, 1  ;;  %s1895_s18 = sphi %s1985_s18, %s33_s18   ;;  %s1891_s17 = sphi %s1983_s17, %s2557_s17   ;;  %s1887_s16 = sphi %s1981_s16, %s2556_s16   ;;  %s1883_s15 = sphi %s1979_s15, %s2555_s15   ;;  %s1879_s14 = sphi %s1977_s14, %s2554_s14   ;;  %s1875_s13 = sphi %s1975_s13, %s2553_s13  }
  0x13   : > { %p2495_p1 = scmp.eq.s32.totalorder %s2006_s19, 0  ;;  %p324_p2 = scmp.lt.s32.totalorder %s1895_s18, 3 }
  0x14   : > { %s1897_s21 = smov [#allocation5]   ;;  %s1898_s24 = smov [#allocation8]  }
  0x15   : > { %p2011_p3 = pnand %p1249_p0, %p324_p2  ;;  %s339_s22 = sshll.u32 %s1897_s21, 4  ;;  %s340_s22 = int_to_ptr.vmem [resolvable:$true] %s339_s22 }
  0x16   : > { %s365_s25 = sshll.u32 %s1898_s24, 4  ;;  %s2521_s2 = sld [smem:[#allocation26_spill]]  ;;  %s366_s25 = int_to_ptr.vmem [resolvable:$true] %s365_s25 }
  0x17   : > { %s2519_s20 = scalar_select %p2011_p3, 1, 0 }
  0x18   : > { %p1405_p4 = pneg %p2011_p3 }
  0x1a   : > { %p2020_p6 = pnand %p1405_p4, %p2495_p1 }
  0x1c   : > { %s1543_s28 = scalar_lea.hbm %s2521_s2, 1024  ;;  %p2032_p8 = pneg %p2020_p6 }
  0x1d   : > { %p1544_p7 = scmp.ne.s32.totalorder %s2521_s2, %s1543_s28  ;;  %p1550_p11 = scmp.lt.u32.totalorder %s1543_s28, %s2521_s2 }
  0x1f   : > { %p1546_p9 = pnand %p2032_p8, %p1544_p7 }
  0x21   : > { %p1547_p10 = pneg %p1546_p9 }
  0x23   : > { %p1552_p12 = pnand %p1550_p11, %p1547_p10 }
  0x25   : > { %1555 = shalt.err (!%p1552_p12)
}
  0x26   : > { %s1556_s24 = scalar_lea.vmem %s340_s22, 1024  ;;  %p1564_p4 = scmp.lt.s32.totalorder %s340_s22, %s340_s22 }
  0x27   : > { %p1557_p13 = scmp.ne.s32.totalorder %s340_s22, %s1556_s24  ;;  %p1565_p5 = scmp.lt.s32.totalorder %s1556_s24, %s1556_s24 }
  0x29   : > { %p1559_p0 = pnand %p1557_p13, %p2032_p8  ;;  %p1566_p1 = por %p1565_p5, %p1564_p4 }
  0x2b   : > { %p1560_p2 = pneg %p1559_p0 }
  0x2d   : > { %p1567_p3 = pnand %p1566_p1, %p1560_p2 }
  0x2f   : > { %1570 = shalt.err (!%p1567_p3)
}
  0x30   : > { %s2500_s26 = smov 128   ;;  %s2501_s27 = smov 8  }
  0x31   : > { %1408 = dma.hbm_to_vmem [thread:$0]  (!%p2020_p6), %s2521_s2, 1024, %s340_s22, [#allocation6], %s2500_s26, %s2500_s26, %s2501_s27  }
  0x32   : > { %s1571_s21 = scalar_lea.hbm %s2488_s4, 512 }
  0x33   : > { %p1572_p1 = scmp.ne.s32.totalorder %s2488_s4, %s1571_s21  ;;  %p1578_p7 = scmp.lt.u32.totalorder %s1571_s21, %s2488_s4 }
  0x35   : > { %p1574_p3 = pnand %p1572_p1, %p2032_p8 }
  0x37   : > { %p1575_p5 = pneg %p1574_p3 }
  0x39   : > { %p1580_p9 = pnand %p1578_p7, %p1575_p5 }
  0x3b   : > { %1583 = shalt.err (!%p1580_p9)
}
  0x3c   : > { %s1584_s28 = scalar_lea.vmem %s366_s25, 512  ;;  %p1592_p13 = scmp.lt.s32.totalorder %s366_s25, %s366_s25 }
  0x3d   : > { %p1585_p10 = scmp.ne.s32.totalorder %s366_s25, %s1584_s28  ;;  %p1593_p0 = scmp.lt.s32.totalorder %s1584_s28, %s1584_s28 }
  0x3f   : > { %p1587_p11 = pnand %p1585_p10, %p2032_p8  ;;  %p1594_p2 = por %p1593_p0, %p1592_p13 }
  0x41   : > { %p1588_p12 = pneg %p1587_p11 }
  0x43   : > { %p1595_p4 = pnand %p1594_p2, %p1588_p12 }
  0x45   : > { %1598 = shalt.err (!%p1595_p4)
}
  0x46   : > { %s2502_s10 = smov 64   ;;  %s1902_s22 = smov 4  }
  0x47   : > { %1414 = dma.hbm_to_vmem [thread:$0]  (!%p2020_p6), %s2488_s4, 512, %s366_s25, [#allocation9], %s2502_s10, %s2502_s10, %s1902_s22  }
  0x48   : > { %s1903_s29 = smov [#allocation11]   ;;  %s1904_s12 = smov [#allocation7]  }
  0x49   : > { %s399_s30 = sshll.u32 %s1903_s29, 4  ;;  %s352_s21 = sshll.u32 %s1904_s12, 4  ;;  %s400_s30 = int_to_ptr.vmem [resolvable:$true] %s399_s30  ;;  %s2072_s21 = int_to_ptr.vmem [resolvable:$true] %s352_s21 }
  0x4a   : > { %s1599_s26 = scalar_lea.hbm %s2490_s6, 512 }
  0x4b   : > { %p1600_p1 = scmp.ne.s32.totalorder %s2490_s6, %s1599_s26  ;;  %p1606_p7 = scmp.lt.u32.totalorder %s1599_s26, %s2490_s6 }
  0x4d   : > { %p1602_p3 = pnand %p1600_p1, %p2032_p8 }
  0x4f   : > { %p1603_p5 = pneg %p1602_p3 }
  0x51   : > { %p1608_p9 = pnand %p1606_p7, %p1603_p5 }
  0x53   : > { %1611 = shalt.err (!%p1608_p9)
}
  0x54   : > { %s1612_s9 = scalar_lea.vmem %s400_s30, 512  ;;  %p1620_p13 = scmp.lt.s32.totalorder %s400_s30, %s400_s30 }
  0x55   : > { %p1613_p10 = scmp.ne.s32.totalorder %s400_s30, %s1612_s9  ;;  %p1621_p0 = scmp.lt.s32.totalorder %s1612_s9, %s1612_s9 }
  0x57   : > { %p1615_p11 = pnand %p1613_p10, %p2032_p8  ;;  %p1622_p2 = por %p1621_p0, %p1620_p13 }
  0x59   : > { %p1616_p12 = pneg %p1615_p11 }
  0x5b   : > { %p1623_p4 = pnand %p1622_p2, %p1616_p12 }
  0x5d   : > { %1626 = shalt.err (!%p1623_p4)
}
  0x5e   : > { %s2503_s2 = smov 256   ;;  %s2505_s27 = smov 16  }
  0x5f   : > { %1420 = dma.hbm_to_vmem [thread:$0]  (!%p2020_p6), %s2490_s6, 512, %s400_s30, [#allocation12], %s2503_s2, %s2503_s2, %s2505_s27  }
  0x60   : > { %s1627_s28 = scalar_lea.hbm %s2487_s3, 512 }
  0x61   : > { %p1628_p1 = scmp.ne.s32.totalorder %s2487_s3, %s1627_s28  ;;  %p1634_p7 = scmp.lt.u32.totalorder %s1627_s28, %s2487_s3 }
  0x63   : > { %p1630_p3 = pnand %p1628_p1, %p2032_p8 }
  0x65   : > { %p1631_p5 = pneg %p1630_p3 }
  0x67   : > { %p1636_p9 = pnand %p1634_p7, %p1631_p5 }
  0x69   : > { %1639 = shalt.err (!%p1636_p9)
}
  0x6a   : > { %s1640_s30 = scalar_lea.vmem %s2072_s21, 512  ;;  %p1648_p13 = scmp.lt.s32.totalorder %s2072_s21, %s2072_s21 }
  0x6b   : > { %p1641_p10 = scmp.ne.s32.totalorder %s2072_s21, %s1640_s30  ;;  %p1649_p0 = scmp.lt.s32.totalorder %s1640_s30, %s1640_s30 }
  0x6d   : > { %p1643_p11 = pnand %p1641_p10, %p2032_p8  ;;  %p1650_p2 = por %p1649_p0, %p1648_p13 }
  0x6f   : > { %p1644_p12 = pneg %p1643_p11 }
  0x71   : > { %p1651_p4 = pnand %p1650_p2, %p1644_p12 }
  0x73   : > { %1654 = shalt.err (!%p1651_p4)
}
  0x74   : > { %s2523_s10 = smov 64   ;;  %s1907_s12 = smov [#allocation10]  }
  0x75   : > { %1411 = dma.hbm_to_vmem [thread:$0]  (!%p2020_p6), %s2487_s3, 512, %s2072_s21, [#allocation6], %s2523_s10, %s2523_s10, %s1902_s22  }
  0x76   : > { %s382_s24 = sshll.u32 %s1907_s12, 4  ;;  %s1908_s28 = smov [#allocation13]   ;;  %s383_s24 = int_to_ptr.vmem [resolvable:$true] %s382_s24 }
  0x77   : > { %s416_s8 = sshll.u32 %s1908_s28, 4  ;;  %s1655_s30 = scalar_lea.hbm %s2489_s5, 512  ;;  %s2121_s8 = int_to_ptr.vmem [resolvable:$true] %s416_s8 }
  0x78   : > { %p1656_p1 = scmp.ne.s32.totalorder %s2489_s5, %s1655_s30  ;;  %p1662_p7 = scmp.lt.u32.totalorder %s1655_s30, %s2489_s5 }
  0x7a   : > { %p1658_p3 = pnand %p1656_p1, %p2032_p8 }
  0x7c   : > { %p1659_p5 = pneg %p1658_p3 }
  0x7e   : > { %p1664_p9 = pnand %p1662_p7, %p1659_p5 }
  0x80   : > { %1667 = shalt.err (!%p1664_p9)
}
  0x81   : > { %s1668_s21 = scalar_lea.vmem %s383_s24, 512  ;;  %p1676_p13 = scmp.lt.s32.totalorder %s383_s24, %s383_s24 }
  0x82   : > { %p1669_p10 = scmp.ne.s32.totalorder %s383_s24, %s1668_s21  ;;  %p1677_p0 = scmp.lt.s32.totalorder %s1668_s21, %s1668_s21 }
  0x84   : > { %p1671_p11 = pnand %p1669_p10, %p2032_p8  ;;  %p1678_p2 = por %p1677_p0, %p1676_p13 }
  0x86   : > { %p1672_p12 = pneg %p1671_p11 }
  0x88   : > { %p1679_p4 = pnand %p1678_p2, %p1672_p12 }
  0x8a   : > { %1682 = shalt.err (!%p1679_p4)
}
  0x8b   : > { %s2524_s2 = smov 16   ;;  %s2525_s27 = smov 256  }
  0x8c   : > { %1417 = dma.hbm_to_vmem [thread:$0]  (!%p2020_p6), %s2489_s5, 512, %s383_s24, [#allocation9], %s2525_s27, %s2525_s27, %s2524_s2  }
  0x8d   : > { %s1683_s25 = scalar_lea.hbm %s2491_s7, 512 }
  0x8e   : > { %p1684_p1 = scmp.ne.s32.totalorder %s2491_s7, %s1683_s25  ;;  %p1690_p7 = scmp.lt.u32.totalorder %s1683_s25, %s2491_s7 }
  0x90   : > { %p1686_p3 = pnand %p1684_p1, %p2032_p8 }
  0x92   : > { %p1687_p5 = pneg %p1686_p3 }
  0x94   : > { %p1692_p9 = pnand %p1690_p7, %p1687_p5 }
  0x96   : > { %1695 = shalt.err (!%p1692_p9)
}
  0x97   : > { %s1696_s24 = scalar_lea.vmem %s2121_s8, 512  ;;  %p1704_p13 = scmp.lt.s32.totalorder %s2121_s8, %s2121_s8 }
  0x98   : > { %p1697_p10 = scmp.ne.s32.totalorder %s2121_s8, %s1696_s24  ;;  %p1705_p0 = scmp.lt.s32.totalorder %s1696_s24, %s1696_s24 }
  0x9a   : > { %p1699_p11 = pnand %p1697_p10, %p2032_p8  ;;  %p1706_p2 = por %p1705_p0, %p1704_p13 }
  0x9c   : > { %p1700_p12 = pneg %p1699_p11 }
  0x9e   : > { %p1707_p4 = pnand %p1706_p2, %p1700_p12 }
  0xa0   : > { %1710 = shalt.err (!%p1707_p4)
}
  0xa1   : > { %1423 = dma.hbm_to_vmem [thread:$0]  (!%p2020_p6), %s2491_s7, 512, %s2121_s8, [#allocation12], %s2525_s27, %s2525_s27, %s2524_s2  }
  0xa2   : > { %s2507_s23 = sadd.s32 4294967294, %s1895_s18   ;;  %s45_s11 = sadd.s32 1, %s1891_s17 }
  0xa3   : > { %p47_p8 = scmp.ge.s32.totalorder %s45_s11, 2  ;;  %s54_s29 = sadd.s32 1, %s1883_s15 }
  0xa4   : > { %p61_p1 = scmp.ne.s32.totalorder %s1883_s15, %s1879_s14  ;;  %p62_p3 = scmp.eq.s32.totalorder %s1895_s18, 0 }
  0xa5   : > { %s2559_s11 = smov (%p47_p8, %s45_s11), 0  ;;  %p67_p7 = scmp.ne.s32.totalorder %s1879_s14, %s1875_s13 }
  0xa6   : > { %p2178_p5 = por %p62_p3, %p61_p1  ;;  %s49_s8 = ssub.s32 %s1891_s17, %s2559_s11 }
  0xa7   : > { %p255_p6 = scmp.eq.s32.totalorder %s2006_s19, 1  ;;  %p52_p9 = scmp.eq.s32.totalorder %s49_s8, 0 }
  0xa8   : > { %p2527_p10 = scmp.eq.s32.totalorder %s2006_s19, 0  ;;  %p261_p13 = scmp.eq.s32.totalorder %s2507_s23, 1 }
  0xa9   : > { %p2193_p12 = por %p255_p6, %p61_p1  ;;  %p1444_p2 = scmp.lt.s32.totalorder %s1895_s18, 2 }
  0xaa   : > { %p2189_p11 = por %p2527_p10, %p67_p7  ;;  %p2202_p0 = por %p261_p13, %p67_p7 }
  0xab   : > { %s2529_s27 = scalar_select %p2193_p12, 1, 0 }
  0xac   : > { %s2200_s28 = scalar_select %p52_p9, %s1883_s15, %s54_s29  }
  0xad   : > { %s2530_s25 = scalar_select %p2202_p0, 1, 0 }
  0xae   : > { %s430_s9 = sand.u32 1, %s1883_s15   ;;  %s1316_s30 = sshll.u32 %s1891_s17, 8 }
  0xaf   : > { %s1257_s26 = sshll.u32 %s430_s9, 4  ;;  %s2531_s0 = sld [smem:[#allocation24_spill]] }
  0xb0   : > { %s434_s10 = scalar_lea.vmem [#allocation2], %s1257_s26  ;;  %p2216_p4 = pnand %p1444_p2, %p2178_p5 }
  0xb1   : > { %s443_s29 = sshll.u32 %s434_s10, 4  ;;  %s2222_s23 = scalar_lea.sflag [#allocation3], %s430_s9  ;;  %s2220_s29 = int_to_ptr.vmem [resolvable:$true] %s443_s29 }
  0xb2   : > { %p1713_p1 = pneg %p2216_p4 }
  0xb5   : > { %s2212_s21 = scalar_lea.hbm %s2531_s0, %s1316_s30  ;;  %s1716_s26 = scalar_lea.hbm %s2531_s0, 512 }
  0xb6   : > { %s1711_s22 = scalar_lea.hbm %s2212_s21, 256  ;;  %p1717_p5 = scmp.lt.u32.totalorder %s2212_s21, %s2531_s0 }
  0xb7   : > { %p1712_p8 = scmp.ne.s32.totalorder %s2212_s21, %s1711_s22  ;;  %p1718_p6 = scmp.lt.u32.totalorder %s1716_s26, %s1711_s22 }
  0xb8   : > { %p1720_p10 = scmp.lt.u32.totalorder %s1711_s22, %s2212_s21 }
  0xb9   : > { %p1714_p3 = pnand %p1713_p1, %p1712_p8  ;;  %p1719_p9 = por %p1718_p6, %p1717_p5 }
  0xbb   : > { %p1715_p7 = pneg %p1714_p3  ;;  %p1721_p13 = por %p1720_p10, %p1719_p9 }
  0xbd   : > { %p1722_p2 = pnand %p1721_p13, %p1715_p7 }
  0xbf   : > { %1725 = shalt.err (!%p1722_p2)
}
  0xc0   : > { %s1726_s9 = scalar_lea.vmem %s2220_s29, 256  ;;  %s1909_s30 = smov [#allocation2]  }
  0xc1   : > { %p1727_p8 = scmp.ne.s32.totalorder %s2220_s29, %s1726_s9  ;;  %s1731_s12 = sshll.u32 %s1909_s30, 4  ;;  %s1732_s12 = int_to_ptr.vmem [resolvable:$false] %s1731_s12 }
  0xc2   : > { %s1733_s24 = scalar_lea.vmem %s1732_s12, 512  ;;  %p1734_p12 = scmp.lt.s32.totalorder %s2220_s29, %s1732_s12 }
  0xc3   : > { %p1729_p3 = pnand %p1727_p8, %p1713_p1  ;;  %p1735_p5 = scmp.lt.s32.totalorder %s1733_s24, %s1726_s9 }
  0xc5   : > { %p1730_p0 = pneg %p1729_p3  ;;  %p1736_p6 = por %p1735_p5, %p1734_p12 }
  0xc7   : > { %p1737_p9 = pnand %p1736_p6, %p1730_p0 }
  0xc9   : > { %1740 = shalt.err (!%p1737_p9)
}
  0xca   : > { %s2533_s22 = smov 8   ;;  %s2534_s26 = smov 128  }
  0xcb   : > { %1427 = dma.hbm_to_vmem [thread:$0]  (!%p2216_p4), %s2212_s21, 256, %s2220_s29, %s2222_s23, %s2534_s26, %s2534_s26, %s2533_s22  }
  0xcc   : > { %p2535_p1 = scmp.ne.s32.totalorder %s2519_s20, 0 }
  0xcd   : > { %s2256_s10 = sand.u32 (!%p2535_p1), 1, %s1879_s14  }
  0xce   : > { %455 = sbr.rel (%p2535_p1) target bundleno = 888 (0x378), region = 52  ;;  %s2259_s9 = sshll.u32 (!%p2535_p1), %s2256_s10, 4 }
  0xcf   : > { %s458_s8 = scalar_lea.sflag (!%p2535_p1), [#allocation3], %s2256_s10  ;;  %s461_s30 = scalar_lea.vmem (!%p2535_p1), [#allocation2], %s2259_s9 }
  0xd5   : > { %1850 = dma.done.wait (%p2189_p11), %s458_s8, 256  }
  0xd6   : > { %1852 = vsyncadd (%p2189_p11), %s458_s8, 4294967040  ;;  %p2536_p12 = scmp.eq.s32.totalorder %s2006_s19, 0 }
  0xd8   : > { %1854 = dma.done.wait (%p2536_p12), [#allocation6], 1536   ;;  %p2537_p0 = pmov %p2536_p12 }
  0xda   : > { %1856 = vsyncadd (%p2537_p0), [#allocation6], 4294965760  ;;  %p2538_p4 = pmov %p2537_p0 }
  0xdb   : > { %p2539_p7 = pmov %p2537_p0 }
  0xdc   : > { %1858 = dma.done.wait (%p2538_p4), [#allocation9], 1024  }
  0xdd   : > { %1860 = vsyncadd (%p2539_p7), [#allocation9], 4294966272  ;;  %p2540_p10 = pmov %p2537_p0 }
  0xde   : > { %p2541_p13 = pmov %p2537_p0 }
  0xdf   : > { %1862 = dma.done.wait (%p2540_p10), [#allocation12], 1024  }
  0xe0   : > { %1864 = vsyncadd (%p2541_p13), [#allocation12], 4294966272  ;;  %v540_v0 = vld [vmem:[%s461_s30] sm:$0xff]  ;;  %vm545_vm0 = vcmask 523264   ;;  %v541_v1 = vld [vmem:[%s461_s30 + $0x8] sm:$0xff]  ;;  %v1910_v10 = vmov 0.0  }
  0xe1   : > { %v543_v2 = vmul.f32 %v540_v0, %v540_v0  ;;  %v544_v3 = vmul.f32 %v541_v1, %v541_v1  ;;  %v1519_v6 = vld [vmem:[#allocation5 + $0x4] ss:$8 sps:$4 sm:$0xff]   ;;  %v1521_v7 = vld [vmem:[#allocation5] ss:$8 sps:$4 sm:$0xff]   ;;  %v1523_v9 = vld [vmem:[#allocation5 + $0x14] ss:$8 sps:$4 sm:$0xff]   ;;  %1349 = vmatprep.subr.bf16.mxu1 %v1910_v10 }
  0xe2   : > { %633 = vmatprep.subr.bf16.mxu0 %v1519_v6  ;;  %v1522_v8 = vld [vmem:[#allocation7] sm:$0xff]   ;;  %v1525_v11 = vld [vmem:[#allocation5 + $0x10] ss:$8 sps:$4 sm:$0xff]   ;;  %v1526_v12 = vld [vmem:[#allocation7 + $0x8] sm:$0xff]   ;;  %v1911_v14 = vmov 0   ;;  %vm1912_vm1 = vmmov 0  }
  0xe3   : > { %v546_v4 = vsel %vm545_vm0, %v543_v2, 0.0  ;;  %v549_v5 = vsel %vm545_vm0, %v544_v3, 0.0  ;;  %634 = vmatpush1.bf16.msra.mxu0 %v1521_v7  ;;  %1350 = vmatpush3.bf16.msra.mxu1 %v1522_v8  ;;  %v1527_v13 = vld [vmem:[#allocation5 + $0x24] ss:$8 sps:$4 sm:$0xff]   ;;  %v1529_v15 = vld [vmem:[#allocation5 + $0x20] ss:$8 sps:$4 sm:$0xff]  }
  0xe4   : > { %547 = vadd.xlane.f32.xlu0 %v546_v4  ;;  %635 = vmatprep.subr.bf16.mxu0 %v1523_v9  ;;  %v1530_v16 = vld [vmem:[#allocation7 + $0x10] sm:$0xff]   ;;  %v1534_v19 = vld [vmem:[#allocation7 + $0x18] sm:$0xff]   ;;  %s2542_s1 = sld [smem:[#allocation25_spill]]  ;;  %v1535_v33 = vld [vmem:[#allocation8] sm:$0xff]   ;;  %s1913_s2 = smov 32   ;;  %vm928_vm2 = vcmask 519168  }
  0xe5   : > { %1351 = vmatprep.subr.bf16.mxu1 %v1910_v10  ;;  %665 = vmatprep.mubr.bf16.mxu0 %v1911_v14  ;;  %v1531_v17 = vld [vmem:[#allocation5 + $0x34] ss:$8 sps:$4 sm:$0xff]   ;;  %v1533_v18 = vld [vmem:[#allocation5 + $0x30] ss:$8 sps:$4 sm:$0xff]   ;;  %v1536_v35 = vld [vmem:[#allocation8 + $0x8] sm:$0xff]   ;;  %s1914_s21 = smov 96  }
  0xe6   : > { %1357 = vmatprep.mubr.msk.bf16.mxu1 %vm1912_vm1, %v1910_v10  ;;  %v1537_v36 = vld [vmem:[#allocation8 + $0x10] sm:$0xff]   ;;  %v1538_v37 = vld [vmem:[#allocation8 + $0x18] sm:$0xff]   ;;  %s2302_s29 = scalar_lea.vmem [#allocation17], %s2259_s9  ;;  %v570_v52 = vld [vmem:[#allocation10] sm:$0xff]  ;;  %s2509_s12 = smov 64   ;;  %vm688_vm3 = vcmask 785408  }
  0xe7   : > { %636 = vmatpush1.bf16.msra.mxu0 %v1525_v11  ;;  %1352 = vmatpush3.bf16.msra.mxu1 %v1526_v12  ;;  %v574_v53 = vld [vmem:[#allocation11] sm:$0xff]  ;;  %v576_v59 = vld [vmem:[#allocation11 + $0x10] sm:$0xff]  ;;  %s2317_s24 = scalar_lea.vmem [#allocation15], %s2259_s9  ;;  %vm709_vm4 = vcmask 261120   ;;  %s2340_s22 = sshll.u32 %s1887_s16, 8 }
  0xe8   : > { %550 = vadd.xlane.f32.xlu0 %v549_v5  ;;  %637 = vmatprep.subr.bf16.mxu0 %v1527_v13  ;;  %v2312_v54 = vld [vmem:[#allocation13] sm:$0xff]  ;;  %v572_v62 = vld [vmem:[#allocation10 + $0x10] sm:$0xff]  ;;  %s517_s26 = scalar_lea.vmem [#allocation14], %s2259_s9  ;;  %s2543_s23 = sld [smem:[#allocation27_spill]] }
  0xe9   : > { %1353 = vmatprep.subr.bf16.mxu1 %v1910_v10  ;;  %v580_v2 = vld [vmem:[#allocation13 + $0x10] sm:$0xff]  ;;  %s994_s8 = sshll.u32 %s517_s26, 4  ;;  %p2544_p2 = scmp.ne.s32.totalorder %s2529_s27, 0  ;;  %s2349_s8 = int_to_ptr.vmem [resolvable:$true] %s994_s8 }
  0xea   : > { %v1271_v29 = vld [vmem:[%s2542_s1] ss:$0 sm:$0xff]  ;;  %s1741_s9 = scalar_lea.vmem %s2349_s8, 256 }
  0xeb   : > { %638 = vmatpush1.bf16.msra.mxu0 %v1529_v15  ;;  %1354 = vmatpush3.bf16.msra.mxu1 %v1530_v16  ;;  %v573_v15 = vld [vmem:[#allocation10 + $0x18] sm:$0xff]  ;;  %p1742_p11 = scmp.ne.s32.totalorder %s2349_s8, %s1741_s9 }
  0xec   : > { %639 = vmatprep.subr.bf16.mxu0 %v1531_v17  ;;  %1355 = vmatprep.subr.bf16.mxu1 %v1910_v10  ;;  %v575_v17 = vld [vmem:[#allocation11 + $0x8] sm:$0xff] }
  0xed   : > { %p1743_p8 = pnand %p1742_p11, %p2544_p2 }
  0xef   : > { %640 = vmatpush1.bf16.msra.mxu0 %v1533_v18  ;;  %1356 = vmatpush3.bf16.msra.mxu1 %v1534_v19  ;;  %p1744_p3 = pneg %p1743_p8 }
  0xf0   : > { %1361 = vmatprep.subr.bf16.mxu0 %v1910_v10 }
 0x171   : > { %v548_v20 = vpop.xlane.xlu0 %547 }
 0x172   : > { %v553_v21 = vmul.f32 0.015625, %v548_v20  ;;  %v577_v20 = vld [vmem:[#allocation11 + $0x18] sm:$0xff] }
 0x174   : > { %v555_v22 = vadd.f32 1.1920929e-07, %v553_v21 }
 0x175   : > { %v551_v23 = vpop.xlane.xlu0 %550 }
 0x176   : > { %1539 = vrsqrt.f32 %v555_v22  ;;  %v554_v24 = vmul.f32 0.015625, %v551_v23 }
 0x178   : > { %v556_v25 = vadd.f32 1.1920929e-07, %v554_v24  ;;  %v571_v24 = vld [vmem:[#allocation10 + $0x8] sm:$0xff] }
 0x17a   : > { %1541 = vrsqrt.f32 %v556_v25 }
 0x180   : > { %v1540_v26 = vpop.eup %1539 }
 0x181   : > { %v559_v27 = vmul.f32 %v1540_v26, %v540_v0 }
 0x183   : > { %v567_v31 = vmul.f32 %v1271_v29, %v559_v27 }
 0x184   : > { %v1542_v28 = vpop.eup %1541 }
 0x185   : > { %v560_v30 = vmul.f32 %v1542_v28, %v541_v1 }
 0x187   : > { %v568_v32 = vmul.f32 %v1271_v29, %v560_v30  ;;  %v581_v29 = vld [vmem:[#allocation13 + $0x18] sm:$0xff] }
 0x189   : > { %v569_v34 = vpack.c.bf16 %v568_v32, %v567_v31 }
 0x18b   : > { %1280 = vmatmul.mubr.msk.bf16.vlgmr.msra.gmra.mrb[0].mxu0 %vm545_vm0, %v569_v34  ;;  %1358 = vmatmul.mubr.msk.bf16.vlgmr.msra.gmra.mrb[0].mxu1 %vm545_vm0, %v569_v34 }
 0x18c   : > { %1362 = vmatpush3.bf16.msra.mxu0 %v1535_v33  ;;  %1369 = vmatprep.mubr.msk.bf16.mxu0 %vm1912_vm1, %v1910_v10 }
 0x18d   : > { %1363 = vmatprep.subr.bf16.mxu0 %v1910_v10 }
 0x190   : > { %1364 = vmatpush3.bf16.msra.mxu0 %v1536_v35 }
 0x191   : > { %1365 = vmatprep.subr.bf16.mxu0 %v1910_v10 }
 0x194   : > { %1366 = vmatpush3.bf16.msra.mxu0 %v1537_v36 }
 0x195   : > { %1367 = vmatprep.subr.bf16.mxu0 %v1910_v10 }
 0x198   : > { %1368 = vmatpush3.bf16.msra.mxu0 %v1538_v37 }
 0x19b   : > { %1370 = vmatmul.mubr.msk.bf16.vlgmr.msra.gmra.mrb[4].mxu0 %vm545_vm0, %v569_v34  ;;  %v579_v34 = vld [vmem:[#allocation13 + $0x8] sm:$0xff] }
 0x25e   : > { %v2289_v38 = vpop.f32.mrb[0].mxu0  ;;  %v806_v39 = vpop.f32.mrb[0].mxu1 }
 0x25f   : > { %821 = vrot.lane.b32.xlu0 %v806_v39, %s1913_s2  ;;  %815 = vrot.lane.b32.xlu1 %v806_v39, %s1914_s21  ;;  %v2291_v40 = vpop.f32.mrb[1].mxu0  ;;  %v1359_v41 = vpop.f32.mrb[1].mxu1  ;;  %v827_v57 = vmul.f32 %v806_v39, %v570_v52  ;;  %v718_v35 = vmul.f32 %v2289_v38, %v570_v52 }
 0x260   : > { %v2293_v42 = vpop.f32.mrb[2].mxu0  ;;  %v809_v43 = vpop.f32.mrb[2].mxu1  ;;  %v719_v36 = vmul.f32 %v2291_v40, %v571_v24 }
 0x261   : > { %v2295_v44 = vpop.f32.mrb[3].mxu0  ;;  %v1360_v45 = vpop.f32.mrb[3].mxu1  ;;  %v828_v3 = vmul.f32 %v809_v43, %v572_v62  ;;  %v720_v21 = vmul.f32 %v2293_v42, %v572_v62 }
 0x262   : > { %v721_v22 = vmul.f32 %v2295_v44, %v573_v15 }
 0x263   : > { %817 = vrot.lane.b32.xlu1 %v809_v43, %s1914_s21  ;;  %707 = vrot.lane.b32.xlu0 %v2293_v42, %s1913_s2 }
 0x267   : > { %823 = vrot.lane.b32.xlu1 %v809_v43, %s1913_s2  ;;  %701 = vrot.lane.b32.xlu0 %v2295_v44, %s1913_s2 }
 0x26b   : > { %680 = vrot.lane.b32.xlu1 %v2289_v38, %s1914_s21 }
 0x26e   : > { %v904_v46 = vpop.f32.mrb[4].mxu0 }
 0x26f   : > { %v1321_v47 = vpack.c.bf16 %v904_v46, %v904_v46  ;;  %v1371_v48 = vpop.f32.mrb[5].mxu0  ;;  %682 = vrot.lane.b32.xlu1 %v2291_v40, %s1914_s21 }
 0x270   : > { %v907_v49 = vpop.f32.mrb[6].mxu0 }
 0x271   : > { %938 = vst.msk [vmem:[%s2302_s29] sm:$0xf] %vm928_vm2, %v1321_v47  ;;  %v1322_v50 = vpack.c.bf16 %v907_v49, %v907_v49  ;;  %v1372_v51 = vpop.f32.mrb[7].mxu0 }
 0x273   : > { %939 = vst.msk [vmem:[%s2302_s29 + $0x4] sm:$0xf] %vm928_vm2, %v1322_v50  ;;  %699 = vrot.lane.b32.xlu1 %v2291_v40, %s1913_s2 }
 0x277   : > { %684 = vrot.lane.b32.xlu1 %v2293_v42, %s1914_s21 }
 0x27b   : > { %686 = vrot.lane.b32.xlu1 %v2295_v44, %s1914_s21  ;;  %s1916_s21 = smov [#allocation14]  }
 0x27f   : > { %705 = vrot.lane.b32.xlu1 %v2289_v38, %s1913_s2  ;;  %s2347_s2 = scalar_lea.hbm %s2543_s23, %s2340_s22 }
 0x2d1   : > { %v822_v55 = vpop.permute.xlu0 %821  ;;  %v816_v56 = vpop.permute.xlu1 %815 }
 0x2d2   : > { %v829_v58 = vmul.f32 %v816_v56, %v574_v53  ;;  %v833_v60 = vmul.f32 %v822_v55, %v2312_v54 }
 0x2d4   : > { %v831_v61 = vadd.f32 %v829_v58, %v827_v57 }
 0x2d5   : > { %v818_v63 = vpop.permute.xlu1 %817  ;;  %v708_v12 = vpop.permute.xlu0 %707 }
 0x2d6   : > { %v830_v0 = vmul.f32 %v818_v63, %v576_v59  ;;  %v835_v1 = vadd.f32 %v833_v60, %v831_v61 }
 0x2d8   : > { %v1319_v4 = vpack.c.bf16 %v835_v1, %v835_v1  ;;  %v832_v6 = vadd.f32 %v830_v0, %v828_v3 }
 0x2d9   : > { %v824_v5 = vpop.permute.xlu1 %823  ;;  %v702_v16 = vpop.permute.xlu0 %701 }
 0x2da   : > { %v834_v7 = vmul.f32 %v824_v5, %v580_v2  ;;  %950 = vrot.lane.b32.xlu1 %v1319_v4, %s2509_s12  ;;  %929 = vst.msk [vmem:[%s2317_s24] sm:$0xf] %vm928_vm2, %v1319_v4  ;;  %v711_v25 = vsel %vm709_vm4, %v708_v12, %v702_v16  ;;  %v717_v26 = vsel %vm709_vm4, %v702_v16, %v708_v12 }
 0x2db   : > { %v732_v42 = vmul.f32 %v717_v26, %v580_v2  ;;  %v733_v43 = vmul.f32 %v711_v25, %v581_v29 }
 0x2dc   : > { %v836_v8 = vadd.f32 %v834_v7, %v832_v6 }
 0x2dd   : > { %v681_v9 = vpop.permute.xlu1 %680 }
 0x2de   : > { %v1320_v10 = vpack.c.bf16 %v836_v8, %v836_v8  ;;  %959 = vrot.lane.b32.xlu1 %v1321_v47, %s2509_s12 }
 0x2e0   : > { %952 = vrot.lane.b32.xlu0 %v1320_v10, %s2509_s12  ;;  %930 = vst.msk [vmem:[%s2317_s24 + $0x4] sm:$0xf] %vm928_vm2, %v1320_v10 }
 0x2e1   : > { %v683_v11 = vpop.permute.xlu1 %682 }
 0x2e2   : > { %v689_v18 = vsel %vm688_vm3, %v681_v9, %v683_v11  ;;  %v697_v19 = vsel %vm688_vm3, %v683_v11, %v681_v9 }
 0x2e3   : > { %v722_v30 = vmul.f32 %v689_v18, %v574_v53  ;;  %v723_v31 = vmul.f32 %v697_v19, %v575_v17 }
 0x2e4   : > { %961 = vrot.lane.b32.xlu0 %v1322_v50, %s2509_s12  ;;  %s1745_s12 = sshll.u32 %s1916_s21, 4  ;;  %s1746_s12 = int_to_ptr.vmem [resolvable:$false] %s1745_s12 }
 0x2e5   : > { %v700_v13 = vpop.permute.xlu1 %699  ;;  %v726_v46 = vadd.f32 %v722_v30, %v718_v35  ;;  %v727_v47 = vadd.f32 %v723_v31, %v719_v36  ;;  %s1747_s0 = scalar_lea.vmem %s1746_s12, 512  ;;  %p1748_p5 = scmp.lt.s32.totalorder %s2349_s8, %s1746_s12 }
 0x2e6   : > { %p1749_p6 = scmp.lt.s32.totalorder %s1747_s0, %s1741_s9 }
 0x2e8   : > { %p1750_p9 = por %p1749_p6, %p1748_p5 }
 0x2e9   : > { %v685_v14 = vpop.permute.xlu1 %684 }
 0x2ea   : > { %p1751_p1 = pnand %p1750_p9, %p1744_p3 }
 0x2ed   : > { %v687_v23 = vpop.permute.xlu1 %686 }
 0x2ee   : > { %v690_v27 = vsel %vm688_vm3, %v685_v14, %v687_v23  ;;  %v698_v28 = vsel %vm688_vm3, %v687_v23, %v685_v14 }
 0x2ef   : > { %v724_v32 = vmul.f32 %v690_v27, %v576_v59  ;;  %v725_v33 = vmul.f32 %v698_v28, %v577_v20 }
 0x2f1   : > { %v728_v37 = vadd.f32 %v724_v32, %v720_v21  ;;  %v729_v39 = vadd.f32 %v725_v33, %v721_v22  ;;  %v706_v41 = vpop.permute.xlu1 %705 }
 0x2f2   : > { %v710_v44 = vsel %vm709_vm4, %v706_v41, %v700_v13  ;;  %v716_v45 = vsel %vm709_vm4, %v700_v13, %v706_v41 }
 0x2f3   : > { %v730_v48 = vmul.f32 %v716_v45, %v2312_v54  ;;  %v731_v49 = vmul.f32 %v710_v44, %v579_v34  ;;  %v736_v38 = vadd.f32 %v732_v42, %v728_v37  ;;  %v737_v40 = vadd.f32 %v733_v43, %v729_v39 }
 0x2f5   : > { %v734_v50 = vadd.f32 %v730_v48, %v726_v46  ;;  %v735_v51 = vadd.f32 %v731_v49, %v727_v47 }
 0x2f7   : > { %v1331_v52 = vpack.c.bf16 %v736_v38, %v734_v50  ;;  %v1336_v53 = vpack.c.bf16 %v737_v40, %v735_v51 }
 0x2f9   : > { %1332 = vst [vmem:[%s517_s26] sm:$0xff] %v1331_v52   ;;  %1338 = vst [vmem:[%s517_s26 + $0x8] sm:$0xff] %v1336_v53  }
 0x2fa   : > { %1754 = shalt.err (!%p1751_p1)
}
 0x2fb   : > { %s1755_s26 = scalar_lea.hbm %s2347_s2, 256  ;;  %s1759_s21 = scalar_lea.hbm %s2543_s23, 512 }
 0x2fc   : > { %p1756_p12 = scmp.ne.s32.totalorder %s2347_s2, %s1755_s26  ;;  %p1760_p7 = scmp.lt.u32.totalorder %s2347_s2, %s2543_s23 }
 0x2fd   : > { %p1761_p10 = scmp.lt.u32.totalorder %s1759_s21, %s1755_s26  ;;  %p1763_p11 = scmp.lt.u32.totalorder %s1755_s26, %s2347_s2 }
 0x2fe   : > { %p1757_p0 = pnand %p1756_p12, %p2544_p2 }
 0x2ff   : > { %p1762_p13 = por %p1761_p10, %p1760_p7 }
 0x300   : > { %p1758_p4 = pneg %p1757_p0 }
 0x301   : > { %p1764_p8 = por %p1763_p11, %p1762_p13 }
 0x303   : > { %p1765_p3 = pnand %p1764_p8, %p1758_p4 }
 0x305   : > { %1768 = shalt.err (!%p1765_p3)
}
 0x306   : > { %s2511_s0 = smov 4   ;;  %s2545_s9 = smov 64  }
 0x307   : > { %s2546_s1 = scalar_lea.sflag [#allocation4], %s2256_s10  ;;  %s1012_s16 = sshll.u32 %s2317_s24, 4  ;;  %s2382_s16 = int_to_ptr.vmem [resolvable:$true] %s1012_s16 }
 0x308   : > { %1399 = dma.vmem_to_hbm [thread:$0]  (%p2544_p2), %s2349_s8, 256, %s2347_s2, %s2546_s1, %s2545_s9, %s2545_s9, %s2511_s0  }
 0x309   : > { %s973_s26 = sand.u32 1, %s2006_s19   ;;  %s2547_s20 = sld [smem:[#allocation28_spill]] }
 0x30a   : > { %s1030_s12 = sshll.u32 %s2302_s29, 4  ;;  %s2395_s1 = scalar_lea.sflag [#allocation16], %s973_s26  ;;  %s2424_s12 = int_to_ptr.vmem [resolvable:$true] %s1030_s12 }
 0x30b   : > { %s1769_s19 = scalar_lea.vmem %s2382_s16, 256  ;;  %s1918_s8 = smov [#allocation15]  }
 0x30c   : > { %p1770_p5 = scmp.ne.s32.totalorder %s2382_s16, %s1769_s19  ;;  %s1773_s2 = sshll.u32 %s1918_s8, 4  ;;  %s1774_s2 = int_to_ptr.vmem [resolvable:$false] %s1773_s2 }
 0x30d   : > { %s1775_s0 = scalar_lea.vmem %s1774_s2, 512  ;;  %p1776_p1 = scmp.lt.s32.totalorder %s2382_s16, %s1774_s2 }
 0x30e   : > { %p1771_p6 = pnand %p1770_p5, %p2544_p2  ;;  %p1777_p12 = scmp.lt.s32.totalorder %s1775_s0, %s1769_s19 }
 0x30f   : > { %s2390_s21 = scalar_lea.hbm %s2547_s20, %s2340_s22 }
 0x310   : > { %p1772_p9 = pneg %p1771_p6  ;;  %p1778_p0 = por %p1777_p12, %p1776_p1 }
 0x312   : > { %p1779_p4 = pnand %p1778_p0, %p1772_p9 }
 0x34c   : > { %v951_v54 = vpop.permute.xlu1 %950 }
 0x34d   : > { %1301 = vst.msk [vmem:[%s2317_s24 + $0x8] sm:$0xf] %vm928_vm2, %v951_v54 }
 0x350   : > { %v960_v55 = vpop.permute.xlu1 %959 }
 0x351   : > { %1303 = vst.msk [vmem:[%s2302_s29 + $0x8] sm:$0xf] %vm928_vm2, %v960_v55 }
 0x352   : > { %v953_v56 = vpop.permute.xlu0 %952 }
 0x353   : > { %1302 = vst.msk [vmem:[%s2317_s24 + $0xc] sm:$0xf] %vm928_vm2, %v953_v56 }
 0x354   : > { %1782 = shalt.err (!%p1779_p4)
}
 0x355   : > { %s1783_s24 = scalar_lea.hbm %s2390_s21, 256  ;;  %s1787_s30 = scalar_lea.hbm %s2547_s20, 512 }
 0x356   : > { %p1784_p7 = scmp.ne.s32.totalorder %s2390_s21, %s1783_s24  ;;  %p1788_p11 = scmp.lt.u32.totalorder %s2390_s21, %s2547_s20 }
 0x357   : > { %p1789_p8 = scmp.lt.u32.totalorder %s1787_s30, %s1783_s24  ;;  %p1791_p5 = scmp.lt.u32.totalorder %s1783_s24, %s2390_s21 }
 0x358   : > { %p1785_p10 = pnand %p1784_p7, %p2544_p2 }
 0x359   : > { %p1790_p3 = por %p1789_p8, %p1788_p11 }
 0x35a   : > { %p1786_p13 = pneg %p1785_p10 }
 0x35b   : > { %p1792_p6 = por %p1791_p5, %p1790_p3 }
 0x35d   : > { %p1793_p9 = pnand %p1792_p6, %p1786_p13 }
 0x35f   : > { %1796 = shalt.err (!%p1793_p9)
}
 0x360   : > { %s2548_s0 = smov 4   ;;  %s2549_s26 = sld [smem:[#allocation29_spill]]  ;;  %v962_v57 = vpop.permute.xlu0 %961 }
 0x361   : > { %1400 = dma.vmem_to_hbm [thread:$0]  (%p2544_p2), %s2382_s16, 256, %s2390_s21, %s2395_s1, %s2545_s9, %s2545_s9, %s2548_s0  }
 0x362   : > { %1304 = vst.msk [vmem:[%s2302_s29 + $0xc] sm:$0xf] %vm928_vm2, %v962_v57  ;;  %s1797_s30 = scalar_lea.vmem %s2424_s12, 256  ;;  %s1919_s16 = smov [#allocation17]  }
 0x363   : > { %p1798_p1 = scmp.ne.s32.totalorder %s2424_s12, %s1797_s30  ;;  %s1801_s21 = sshll.u32 %s1919_s16, 4  ;;  %s1802_s21 = int_to_ptr.vmem [resolvable:$false] %s1801_s21 }
 0x364   : > { %s1803_s8 = scalar_lea.vmem %s1802_s21, 512  ;;  %p1804_p4 = scmp.lt.s32.totalorder %s2424_s12, %s1802_s21 }
 0x365   : > { %p1799_p12 = pnand %p1798_p1, %p2544_p2  ;;  %p1805_p7 = scmp.lt.s32.totalorder %s1803_s8, %s1797_s30 }
 0x366   : > { %s2430_s10 = scalar_lea.hbm %s2549_s26, %s2340_s22 }
 0x367   : > { %p1800_p0 = pneg %p1799_p12  ;;  %p1806_p10 = por %p1805_p7, %p1804_p4 }
 0x369   : > { %p1807_p13 = pnand %p1806_p10, %p1800_p0 }
 0x36b   : > { %1810 = shalt.err (!%p1807_p13)
}
 0x36c   : > { %s1811_s29 = scalar_lea.hbm %s2430_s10, 256  ;;  %s1815_s19 = scalar_lea.hbm %s2549_s26, 512 }
 0x36d   : > { %p1812_p11 = scmp.ne.s32.totalorder %s2430_s10, %s1811_s29  ;;  %p1816_p5 = scmp.lt.u32.totalorder %s2430_s10, %s2549_s26 }
 0x36e   : > { %p1817_p6 = scmp.lt.u32.totalorder %s1815_s19, %s1811_s29  ;;  %p1819_p1 = scmp.lt.u32.totalorder %s1811_s29, %s2430_s10 }
 0x36f   : > { %p1813_p8 = pnand %p1812_p11, %p2544_p2 }
 0x370   : > { %p1818_p9 = por %p1817_p6, %p1816_p5 }
 0x371   : > { %p1814_p3 = pneg %p1813_p8 }
 0x372   : > { %p1820_p12 = por %p1819_p1, %p1818_p9 }
 0x374   : > { %p1821_p0 = pnand %p1820_p12, %p1814_p3 }
 0x376   : > { %1824 = shalt.err (!%p1821_p0)
}
 0x377   : > { %1401 = dma.vmem_to_hbm [thread:$0]  (%p2544_p2), %s2424_s12, 256, %s2430_s10, %s2395_s1, %s2545_s9, %s2545_s9, %s2548_s0  }
 0x378 PF: > { %s1045_s30 = sand.u32 1, %s1875_s13   ;;  %p2550_p4 = scmp.ne.s32.totalorder %s2530_s25, 0 }
 0x379   : > { %p2551_p7 = scmp.ge.s32.totalorder %s1895_s18, 2  ;;  %s1046_s21 = scalar_lea.sflag [#allocation4], %s1045_s30 }
 0x37b   : > { %p1429_p10 = pnand %p2551_p7, %p2550_p4 }
 0x37d   : > { %1866 = dma.done.wait (!%p1429_p10), %s1046_s21, 256  }
 0x37e   : > { %1868 = vsyncadd (!%p1429_p10), %s1046_s21, 4294967040  ;;  %s2552_s27 = sadd.s32 4294967294, %s1895_s18  }
 0x37f   : > { %s1054_s8 = sand.u32 1, %s2552_s27  }
 0x380   : > { %s1055_s29 = scalar_lea.sflag [#allocation16], %s1054_s8 }
 0x381   : > { %1870 = dma.done.wait (!%p1429_p10), %s1055_s29, 512  }
 0x382   : > { %1872 = vsyncadd (!%p1429_p10), %s1055_s29, 4294966784  ;;  %s33_s18 = sadd.s32 1, %s1895_s18   ;;  %s2553_s13 = smov %s1879_s14 }
 0x383   : > { %p30_p2 = scmp.ge.s32.totalorder %s33_s18, 4   ;;  %s2554_s14 = smov %s1883_s15 }
 0x384   : > { %s2555_s15 = smov %s2200_s28  ;;  %s2556_s16 = smov %s1891_s17 }
 0x385   : > { %s2557_s17 = smov %s2559_s11  ;;  %32 = sbr.rel (!%p30_p2) target bundleno = 18 (0x12), region = 159 }
 0x38c   :  { %1069 = vsyncpa [#allocation3], 1 }
 0x38d   :  { %1071 = vsyncpa [#allocation3 + $0x1], 1 }
 0x38e   :  { %1072 = vsyncpa [#allocation6], 1 }
 0x38f   :  { %1073 = vsyncpa [#allocation9], 1 }
 0x390   :  { %1074 = vsyncpa [#allocation12], 1 }
 0x391   :  { %1075 = vsyncpa [#allocation4], 1 }
 0x392   :  { %1077 = vsyncpa [#allocation4 + $0x1], 1 }
 0x393   :  { %1078 = vsyncpa [#allocation16], 1 }
 0x394   :  { %1080 = vsyncpa [#allocation16 + $0x1], 1 }

</bundles_post_ra>
